<compile_context>
chip_gen: v7x
topology: tpu7x:2x2x1
jax: 0.10.0
libtpu: 0.0.40
codegen_flags: <defaults>
</compile_context>

<pallas_src>
import functools

import jax
import jax.numpy as jnp
from jax import lax
from jax.experimental import pallas as pl
from jax.experimental.pallas import tpu as pltpu

BN_EPS = 1e-5
_F32_MAX = float(jnp.finfo(jnp.float32).max)


def _round_down(x, m):
    return (x // m) * m


def _vmem_limit_bytes():
    # Generation-aware scoped-VMEM limit: ~75% of physical VMEM, capped at
    # 100 MiB (v5e/v6e: 128 MiB -> 96 MiB, v7x: 64 MiB -> 48 MiB).
    try:
        cap = int(pltpu.get_tpu_info().vmem_capacity_bytes)
    except Exception:
        cap = 64 * 1024 * 1024
    return int(min(cap * 3 // 4, 100 * 1024 * 1024))


# ----------------------------------------------------------------------------
# Fast path (single row-tile): Linear + batch stats + BN + ReLU + (@ w2)
# ----------------------------------------------------------------------------
def _fused_small_kernel(x_ref, w1_ref, b1_ref, g_ref, beta_ref, w2_ref, o_ref,
                        *, inv_m):
    h = jnp.dot(x_ref[...], w1_ref[...],
                preferred_element_type=jnp.float32) + b1_ref[...]      # [M, C]
    m = x_ref.shape[0]
    # Column sums via MXU (ones-row matmul) instead of XLU axis-0 reductions.
    ones = jnp.ones((1, m), jnp.float32)
    s = jnp.dot(ones, h, preferred_element_type=jnp.float32)          # [1, C]
    s2 = jnp.dot(ones, h * h, preferred_element_type=jnp.float32)     # [1, C]
    mean = s * inv_m
    var = jnp.maximum(s2 * inv_m - mean * mean, 0.0)                   # biased
    scale = g_ref[...] * lax.rsqrt(var + BN_EPS)
    shift = beta_ref[...] - mean * scale
    a = jnp.maximum(h * scale + shift, 0.0)
    o_ref[...] = jnp.dot(a.astype(jnp.bfloat16), w2_ref[...],
                         preferred_element_type=jnp.float32).astype(o_ref.dtype)


# ----------------------------------------------------------------------------
# Kernel A1: tiled Linear + per-tile partial batch statistics (parallel grid)
# ----------------------------------------------------------------------------
def _linear_stats_kernel(x_ref, w_ref, b_ref, h_ref, s_ref, s2_ref,
                         *, tm, m_total):
    i = pl.program_id(0)
    h = jnp.dot(x_ref[...], w_ref[...],
                preferred_element_type=jnp.float32) + b_ref[...]       # [tm, C]
    h_ref[...] = h.astype(h_ref.dtype)

    if m_total % tm != 0:
        # Ragged last tile: padded rows are unspecified -> mask BEFORE the sums.
        row = i * tm + lax.broadcasted_iota(jnp.int32, (tm, 1), 0)
        h = jnp.where(row < m_total, h, 0.0)

    ones = jnp.ones((1, tm), jnp.float32)
    s = jnp.dot(ones, h, preferred_element_type=jnp.float32)           # [1, C]
    s2 = jnp.dot(ones, h * h, preferred_element_type=jnp.float32)      # [1, C]
    s_ref[...] = s.reshape(s_ref.shape)
    s2_ref[...] = s2.reshape(s2_ref.shape)


# ----------------------------------------------------------------------------
# Kernel A2: BatchNorm (precomputed scale/shift) + ReLU + pre-multiply by w2
# ----------------------------------------------------------------------------
def _bn_relu_w2_kernel(h_ref, scale_ref, shift_ref, w2_ref, o_ref):
    h = h_ref[...].astype(jnp.float32)
    a = jnp.maximum(h * scale_ref[...] + shift_ref[...], 0.0)
    o_ref[...] = jnp.dot(a.astype(jnp.bfloat16), w2_ref[...],
                         preferred_element_type=jnp.float32).astype(o_ref.dtype)


# ----------------------------------------------------------------------------
# Kernel B: square_distance + 3-NN inverse-distance interpolation (+ bias)
# ----------------------------------------------------------------------------
def _interp_kernel(pos_t_ref, pos_sq_ref, pos_sub_t_ref, pos_sub_sq_ref,
                   xs_ref, b2_ref, o_ref, *, idx_bits):
    pos_t = pos_t_ref[0]            # [d_p, tn]  lane-dense coordinates
    pos_sq = pos_sq_ref[0]          # [tn, 1]    precomputed |pos|^2
    pos_sub_t = pos_sub_t_ref[0]    # [d_p, N_]
    pos_sub_sq = pos_sub_sq_ref[0]  # [1, N_]
    xs = xs_ref[0]                  # [N_, C]    bf16 features ALREADY @ w2

    tn = pos_sq.shape[0]
    ns = pos_sub_sq.shape[1]

    # square_distance (same formula as the PyTorch reference, incl. the clamp).
    cross = lax.dot_general(pos_t, pos_sub_t,
                            dimension_numbers=(((0,), (0,)), ((), ())),
                            preferred_element_type=jnp.float32)         # [tn, N_]
    dist = jnp.maximum(pos_sq + pos_sub_sq - 2.0 * cross, 1e-16)

    # 3-NN selection with a single fused (value, index) lane-min per iteration:
    # dist > 0, so its f32 bit pattern is order-preserving as int32; pack the
    # column index into the low `idx_bits` mantissa bits and min the key.
    idx_mask = (1 << idx_bits) - 1
    col = lax.broadcasted_iota(jnp.int32, (tn, ns), 1)
    bits = pltpu.bitcast(dist, jnp.int32)
    keyf = pltpu.bitcast((bits & jnp.int32(~idx_mask)) | col, jnp.float32)

    w_mat = jnp.zeros((tn, ns), jnp.float32)
    ww = jnp.zeros((tn, 1), jnp.float32)
    for _ in range(3):
        kmin = jnp.min(keyf, axis=-1, keepdims=True)                    # XLU reduce
        kbits = pltpu.bitcast(kmin, jnp.int32)
        sel = kbits & idx_mask                                          # [tn, 1]
        v = pltpu.bitcast(kbits & jnp.int32(~idx_mask), jnp.float32)    # [tn, 1]
        inv_v = pl.reciprocal(v, approx=True)                           # EUP slot
        onehot = col == sel                                             # [tn, N_]
        # Selected columns are disjoint across iterations -> overwrite == add.
        w_mat = jnp.where(onehot, inv_v, w_mat)
        ww = ww + inv_v
        keyf = jnp.where(onehot, _F32_MAX, keyf)                        # exclude

    # Gather-as-matmul on the MXU (bf16 operands, f32 accumulate); w2 was
    # hoisted into xs, so only a row-scale and the bias remain.
    yy = jnp.dot(w_mat.astype(jnp.bfloat16), xs,
                 preferred_element_type=jnp.float32)                    # [tn, C]
    o_ref[0] = yy * pl.reciprocal(ww, approx=True) + b2_ref[...]


# ----------------------------------------------------------------------------
# Wrapper
# ----------------------------------------------------------------------------
def transition_up(x, x_sub, pos, pos_sub, params, *, max_interp_rows=None):
    del x  # unused by the PyTorch forward as well
    B, Ns, d_in = x_sub.shape
    _, N, d_p = pos.shape
    C = params["w1"].shape[1]
    M = B * Ns
    vmem_limit = _vmem_limit_bytes()

    # Weights cast once here (not per grid step inside the kernels).
    w1 = params["w1"].astype(jnp.bfloat16)
    w2 = params["w2"].astype(jnp.bfloat16)
    b1 = params["b1"].reshape(1, C).astype(jnp.float32)
    gamma = params["gamma"].reshape(1, C).astype(jnp.float32)
    beta = params["beta"].reshape(1, C).astype(jnp.float32)
    b2 = params["b2"].reshape(1, C).astype(jnp.float32)

    x2d = x_sub.reshape(M, d_in).astype(jnp.bfloat16)

    tm = M if M <= 1024 else 1024
    m_steps = pl.cdiv(M, tm)

    if m_steps == 1:
        # ---- small-M fast path: one fused kernel, no h HBM roundtrip -------
        xs2 = pl.pallas_call(
            functools.partial(_fused_small_kernel, inv_m=1.0 / M),
            out_shape=jax.ShapeDtypeStruct((M, C), jnp.bfloat16),
            grid_spec=pltpu.PrefetchScalarGridSpec(
                num_scalar_prefetch=0,
                grid=(1,),
                in_specs=[
                    pl.BlockSpec((M, d_in), lambda i: (0, 0)),
                    pl.BlockSpec((d_in, C), lambda i: (0, 0)),
                    pl.BlockSpec((1, C), lambda i: (0, 0)),
                    pl.BlockSpec((1, C), lambda i: (0, 0)),
                    pl.BlockSpec((1, C), lambda i: (0, 0)),
                    pl.BlockSpec((C, C), lambda i: (0, 0)),
                ],
                out_specs=pl.BlockSpec((M, C), lambda i: (0, 0)),
            ),
            compiler_params=pltpu.CompilerParams(
                dimension_semantics=("arbitrary",),
                vmem_limit_bytes=vmem_limit),
        )(x2d, w1, b1, gamma, beta, w2)
    else:
        # ---- Kernel A1: Linear + per-tile partial stats (parallel grid) ----
        h, s_parts, s2_parts = pl.pallas_call(
            functools.partial(_linear_stats_kernel, tm=tm, m_total=M),
            out_shape=(jax.ShapeDtypeStruct((M, C), jnp.bfloat16),
                       jax.ShapeDtypeStruct((m_steps, 1, C), jnp.float32),
                       jax.ShapeDtypeStruct((m_steps, 1, C), jnp.float32)),
            grid_spec=pltpu.PrefetchScalarGridSpec(
                num_scalar_prefetch=0,
                grid=(m_steps,),
                in_specs=[
                    pl.BlockSpec((tm, d_in), lambda i: (i, 0)),
                    pl.BlockSpec((d_in, C), lambda i: (0, 0)),
                    pl.BlockSpec((1, C), lambda i: (0, 0)),
                ],
                out_specs=(
                    pl.BlockSpec((tm, C), lambda i: (i, 0)),
                    pl.BlockSpec((1, 1, C), lambda i: (i, 0, 0)),
                    pl.BlockSpec((1, 1, C), lambda i: (i, 0, 0)),
                ),
            ),
            compiler_params=pltpu.CompilerParams(
                dimension_semantics=("parallel",),
                vmem_limit_bytes=vmem_limit),
        )(x2d, w1, b1)

        # Tiny (1, C) stat finalization in plain XLA.
        s = jnp.sum(s_parts, axis=0)                      # [1, C]
        s2 = jnp.sum(s2_parts, axis=0)                    # [1, C]
        mean = s / M
        var = jnp.maximum(s2 / M - mean * mean, 0.0)      # biased (training-mode)
        scale = gamma * lax.rsqrt(var + BN_EPS)
        shift = beta - mean * scale

        # ---- Kernel A2: BN + ReLU + pre-multiply by w2 ----------------------
        xs2 = pl.pallas_call(
            _bn_relu_w2_kernel,
            out_shape=jax.ShapeDtypeStruct((M, C), jnp.bfloat16),
            grid_spec=pltpu.PrefetchScalarGridSpec(
                num_scalar_prefetch=0,
                grid=(m_steps,),
                in_specs=[
                    pl.BlockSpec((tm, C), lambda i: (i, 0)),
                    pl.BlockSpec((1, C), lambda i: (0, 0)),
                    pl.BlockSpec((1, C), lambda i: (0, 0)),
                    pl.BlockSpec((C, C), lambda i: (0, 0)),
                ],
                out_specs=pl.BlockSpec((tm, C), lambda i: (i, 0)),
            ),
            compiler_params=pltpu.CompilerParams(
                dimension_semantics=("parallel",),
                vmem_limit_bytes=vmem_limit),
        )(h, scale, shift, w2)

    xs2 = xs2.reshape(B, Ns, C)

    # ---- Kernel B: per-(batch, N-tile) 3-NN interpolation -------------------
    # Lane-dense coordinate layout [B, d_p, N] + precomputed squared norms so
    # the kernel needs no relayouts and the coordinate DMA is dense.
    pos_t = jnp.transpose(pos, (0, 2, 1))                            # [B, d_p, N]
    pos_sub_t = jnp.transpose(pos_sub, (0, 2, 1))                    # [B, d_p, N_]
    pos_sq = jnp.sum(pos * pos, axis=-1, keepdims=True)              # [B, N, 1]
    pos_sub_sq = jnp.sum(pos_sub * pos_sub, axis=-1)[:, None, :]     # [B, 1, N_]

    if N <= 128:
        tn = N
    else:
        # ~6 [tn, N_] f32 intermediates are simultaneously live in the kernel
        # (dist, keyf, col, w_mat, onehot, temporaries); leave half of the
        # scoped-VMEM limit for them, the rest for resident xs2/pos_sub blocks
        # and the double-buffered I/O tiles.
        budget = vmem_limit // 2
        rows = _round_down(budget // (6 * 4 * Ns), 128)
        cap = 4096 if max_interp_rows is None else max_interp_rows
        tn = int(min(N, cap, max(128, rows)))
        # TODO(synk): for extremely large N_ even tn=128 can exceed v7x VMEM;
        # an inner N_ tile would be required in that regime.
    n_steps = pl.cdiv(N, tn)
    idx_bits = max((Ns - 1).bit_length(), 1)

    # Single flattened parallel grid axis (b, n) -> both v7x cores get work
    # even when B == 1 or B is odd.
    out = pl.pallas_call(
        functools.partial(_interp_kernel, idx_bits=idx_bits),
        out_shape=jax.ShapeDtypeStruct((B, N, C), jnp.float32),
        grid_spec=pltpu.PrefetchScalarGridSpec(
            num_scalar_prefetch=0,
            grid=(B * n_steps,),
            in_specs=[
                pl.BlockSpec((1, d_p, tn), lambda g: (g // n_steps, 0, g % n_steps)),
                pl.BlockSpec((1, tn, 1), lambda g: (g // n_steps, g % n_steps, 0)),
                pl.BlockSpec((1, d_p, Ns), lambda g: (g // n_steps, 0, 0)),
                pl.BlockSpec((1, 1, Ns), lambda g: (g // n_steps, 0, 0)),
                pl.BlockSpec((1, Ns, C), lambda g: (g // n_steps, 0, 0)),
                pl.BlockSpec((1, C), lambda g: (0, 0)),
            ],
            out_specs=pl.BlockSpec((1, tn, C),
                                   lambda g: (g // n_steps, g % n_steps, 0)),
        ),
        compiler_params=pltpu.CompilerParams(
            dimension_semantics=("parallel",),
            vmem_limit_bytes=vmem_limit),
    )(pos_t, pos_sq, pos_sub_t, pos_sub_sq, xs2, b2)
    return out


# ----------------------------------------------------------------------------
# Pure-JAX reference (for a sanity check)
# ----------------------------------------------------------------------------
def _reference(x_sub, pos, pos_sub, params):
    B, Ns, d_in = x_sub.shape
    h = x_sub.reshape(B * Ns, d_in) @ params["w1"] + params["b1"]
    mean = h.mean(axis=0)
    var = ((h - mean) ** 2).mean(axis=0)
    h = (h - mean) / jnp.sqrt(var + BN_EPS) * params["gamma"] + params["beta"]
    h = jnp.maximum(h, 0.0).reshape(B, Ns, -1)

    def one(pos_b, pos_sub_b, h_b):
        dist = -2.0 * pos_b @ pos_sub_b.T
        dist = dist + jnp.sum(pos_b ** 2, -1)[:, None]
        dist = dist + jnp.sum(pos_sub_b ** 2, -1)[None, :]
        dist = jnp.maximum(dist, 1e-16)
        neg_v, idx = lax.top_k(-dist, 3)
        w = 1.0 / (-neg_v)                       # [N, 3]
        y = h_b[idx]                             # [N, 3, C]
        return (y * w[..., None]).sum(1) / w.sum(1, keepdims=True)

    x_interp = jax.vmap(one)(pos, pos_sub, h)
    return x_interp @ params["w2"] + params["b2"]


def _make_params(key, in_channels, out_channels):
    ks = jax.random.split(key, 6)
    return {
        "w1": 0.1 * jax.random.normal(ks[0], (in_channels, out_channels), jnp.float32),
        "b1": 0.1 * jax.random.normal(ks[1], (out_channels,), jnp.float32),
        "gamma": 1.0 + 0.1 * jax.random.normal(ks[2], (out_channels,), jnp.float32),
        "beta": 0.1 * jax.random.normal(ks[3], (out_channels,), jnp.float32),
        "w2": 0.1 * jax.random.normal(ks[4], (out_channels, out_channels), jnp.float32),
        "b2": 0.1 * jax.random.normal(ks[5], (out_channels,), jnp.float32),
    }


if __name__ == "__main__":
    key = jax.random.PRNGKey(0)

    # ---- test 1: small shapes, single-tile fused fast path ------------------
    B, N, Ns, d_p = 2, 16, 8, 3
    in_channels, out_channels = 8, 16
    k_par, k_x, k_xs, k_p, k_ps, key = jax.random.split(key, 6)
    params = _make_params(k_par, in_channels, out_channels)
    x = jax.random.normal(k_x, (B, N, out_channels), jnp.float32)     # unused
    x_sub = jax.random.normal(k_xs, (B, Ns, in_channels), jnp.float32)
    pos = jax.random.normal(k_p, (B, N, d_p), jnp.float32)
    pos_sub = jax.random.normal(k_ps, (B, Ns, d_p), jnp.float32)

    out = jax.block_until_ready(transition_up(x, x_sub, pos, pos_sub, params))
    ref = _reference(x_sub, pos, pos_sub, params)
    assert out.shape == (B, N, out_channels)
    assert jnp.allclose(out, ref, atol=2e-2, rtol=2e-2), "mismatch vs reference (small)"

    # ---- test 2: multi-tile A path (ragged last tile) + tiled Kernel B ------
    B2, N2, Ns2 = 6, 256, 192          # M = 1152 > 1024 -> two row-tiles
    k_par, k_x, k_xs, k_p, k_ps, key = jax.random.split(key, 6)
    params2 = _make_params(k_par, in_channels, out_channels)
    x2 = jax.random.normal(k_x, (B2, N2, out_channels), jnp.float32)  # unused
    x_sub2 = jax.random.normal(k_xs, (B2, Ns2, in_channels), jnp.float32)
    pos2 = jax.random.normal(k_p, (B2, N2, d_p), jnp.float32)
    pos_sub2 = jax.random.normal(k_ps, (B2, Ns2, d_p), jnp.float32)

    out2 = jax.block_until_ready(
        transition_up(x2, x_sub2, pos2, pos_sub2, params2, max_interp_rows=128))
    ref2 = _reference(x_sub2, pos2, pos_sub2, params2)
    assert out2.shape == (B2, N2, out_channels)
    assert bool(jnp.isfinite(out2).all())
    # Near-duplicate 3rd/4th neighbours can legitimately swap between the fused
    # (value,index) lane-min and lax.top_k; allow a tiny fraction of such rows.
    err = jnp.abs(out2 - ref2)
    tol = 2e-2 * (1.0 + jnp.abs(ref2))
    frac_ok = float(jnp.mean((err <= tol).astype(jnp.float32)))
    assert frac_ok >= 0.98, f"too many mismatches vs reference (large): {frac_ok}"

    print("KERNEL_OK")
</pallas_src>

<mosaic_0001>
module attributes {stable_mosaic.version = 11 : i64} {
  func.func @_fused_small_kernel(%arg0: i32, %arg1: memref<16x8xbf16, #tpu.memory_space<vmem>>, %arg2: memref<8x16xbf16, #tpu.memory_space<vmem>>, %arg3: memref<1x16xf32, #tpu.memory_space<vmem>>, %arg4: memref<1x16xf32, #tpu.memory_space<vmem>>, %arg5: memref<1x16xf32, #tpu.memory_space<vmem>>, %arg6: memref<16x16xbf16, #tpu.memory_space<vmem>>, %arg7: memref<16x16xbf16, #tpu.memory_space<vmem>>) attributes {dimension_semantics = [#tpu.dimension_semantics<arbitrary>], iteration_bounds = array<i64: 1>, scalar_prefetch = 0 : i64, scratch_operands = 0 : i64, tpu.core_type = #tpu.core_type<tc>, window_params = [{pipeline_mode = #tpu.pipeline_mode<synchronous>, transform_indices = @transform_0, window_bounds = array<i64: 16, 8>}, {pipeline_mode = #tpu.pipeline_mode<synchronous>, transform_indices = @transform_1, window_bounds = array<i64: 8, 16>}, {pipeline_mode = #tpu.pipeline_mode<synchronous>, transform_indices = @transform_2, window_bounds = array<i64: 1, 16>}, {pipeline_mode = #tpu.pipeline_mode<synchronous>, transform_indices = @transform_3, window_bounds = array<i64: 1, 16>}, {pipeline_mode = #tpu.pipeline_mode<synchronous>, transform_indices = @transform_4, window_bounds = array<i64: 1, 16>}, {pipeline_mode = #tpu.pipeline_mode<synchronous>, transform_indices = @transform_5, window_bounds = array<i64: 16, 16>}, {pipeline_mode = #tpu.pipeline_mode<synchronous>, transform_indices = @transform_6, window_bounds = array<i64: 16, 16>}]} {
    %c0 = arith.constant 0 : index
    %c0_0 = arith.constant 0 : index
    %0 = vector.load %arg1[%c0, %c0_0] : memref<16x8xbf16, #tpu.memory_space<vmem>>, vector<16x8xbf16>
    %c0_1 = arith.constant 0 : index
    %c0_2 = arith.constant 0 : index
    %1 = vector.load %arg2[%c0_1, %c0_2] : memref<8x16xbf16, #tpu.memory_space<vmem>>, vector<8x16xbf16>
    %cst = arith.constant dense<0.000000e+00> : vector<16x16xf32>
    %2 = tpu.matmul %0, %1, %cst {dimension_numbers = #tpu.dot_dimension_numbers<[1], [0], [0], [1], [0, 0, 1, 1], [], []>} : vector<16x8xbf16>, vector<8x16xbf16>, vector<16x16xf32> -> vector<16x16xf32>
    %c0_3 = arith.constant 0 : index
    %c0_4 = arith.constant 0 : index
    %3 = vector.load %arg3[%c0_3, %c0_4] : memref<1x16xf32, #tpu.memory_space<vmem>>, vector<1x16xf32>
    %4 = vector.broadcast %3 : vector<1x16xf32> to vector<16x16xf32>
    %5 = arith.addf %2, %4 : vector<16x16xf32>
    %cst_5 = arith.constant 1.000000e+00 : f32
    %6 = vector.broadcast %cst_5 : f32 to vector<1x16xf32>
    %cst_6 = arith.constant dense<0.000000e+00> : vector<1x16xf32>
    %7 = tpu.matmul %6, %5, %cst_6 {dimension_numbers = #tpu.dot_dimension_numbers<[1], [0], [0], [1], [0, 0, 1, 1], [], []>} : vector<1x16xf32>, vector<16x16xf32>, vector<1x16xf32> -> vector<1x16xf32>
    %8 = arith.mulf %5, %5 : vector<16x16xf32>
    %cst_7 = arith.constant dense<0.000000e+00> : vector<1x16xf32>
    %9 = tpu.matmul %6, %8, %cst_7 {dimension_numbers = #tpu.dot_dimension_numbers<[1], [0], [0], [1], [0, 0, 1, 1], [], []>} : vector<1x16xf32>, vector<16x16xf32>, vector<1x16xf32> -> vector<1x16xf32>
    %cst_8 = arith.constant 6.250000e-02 : f32
    %10 = vector.broadcast %cst_8 : f32 to vector<1x16xf32>
    %11 = arith.mulf %7, %10 : vector<1x16xf32>
    %cst_9 = arith.constant 6.250000e-02 : f32
    %12 = vector.broadcast %cst_9 : f32 to vector<1x16xf32>
    %13 = arith.mulf %9, %12 : vector<1x16xf32>
    %14 = arith.mulf %11, %11 : vector<1x16xf32>
    %15 = arith.subf %13, %14 : vector<1x16xf32>
    %cst_10 = arith.constant 0.000000e+00 : f32
    %16 = vector.broadcast %cst_10 : f32 to vector<1x16xf32>
    %17 = arith.maximumf %15, %16 : vector<1x16xf32>
    %c0_11 = arith.constant 0 : index
    %c0_12 = arith.constant 0 : index
    %18 = vector.load %arg4[%c0_11, %c0_12] : memref<1x16xf32, #tpu.memory_space<vmem>>, vector<1x16xf32>
    %cst_13 = arith.constant 9.99999974E-6 : f32
    %19 = vector.broadcast %cst_13 : f32 to vector<1x16xf32>
    %20 = arith.addf %17, %19 : vector<1x16xf32>
    %21 = math.rsqrt %20 : vector<1x16xf32>
    %22 = arith.mulf %18, %21 : vector<1x16xf32>
    %c0_14 = arith.constant 0 : index
    %c0_15 = arith.constant 0 : index
    %23 = vector.load %arg5[%c0_14, %c0_15] : memref<1x16xf32, #tpu.memory_space<vmem>>, vector<1x16xf32>
    %24 = arith.mulf %11, %22 : vector<1x16xf32>
    %25 = arith.subf %23, %24 : vector<1x16xf32>
    %26 = vector.broadcast %22 : vector<1x16xf32> to vector<16x16xf32>
    %27 = arith.mulf %5, %26 : vector<16x16xf32>
    %28 = vector.broadcast %25 : vector<1x16xf32> to vector<16x16xf32>
    %29 = arith.addf %27, %28 : vector<16x16xf32>
    %cst_16 = arith.constant 0.000000e+00 : f32
    %30 = vector.broadcast %cst_16 : f32 to vector<16x16xf32>
    %31 = arith.maximumf %29, %30 : vector<16x16xf32>
    %32 = arith.truncf %31 : vector<16x16xf32> to vector<16x16xbf16>
    %c0_17 = arith.constant 0 : index
    %c0_18 = arith.constant 0 : index
    %33 = vector.load %arg6[%c0_17, %c0_18] : memref<16x16xbf16, #tpu.memory_space<vmem>>, vector<16x16xbf16>
    %cst_19 = arith.constant dense<0.000000e+00> : vector<16x16xf32>
    %34 = tpu.matmul %32, %33, %cst_19 {dimension_numbers = #tpu.dot_dimension_numbers<[1], [0], [0], [1], [0, 0, 1, 1], [], []>} : vector<16x16xbf16>, vector<16x16xbf16>, vector<16x16xf32> -> vector<16x16xf32>
    %35 = arith.truncf %34 : vector<16x16xf32> to vector<16x16xbf16>
    %c0_20 = arith.constant 0 : index
    %c0_21 = arith.constant 0 : index
    %36 = vector.load %arg7[%c0_20, %c0_21] : memref<16x16xbf16, #tpu.memory_space<vmem>>, vector<16x16xbf16>
    tpu.vector_store %arg7[%c0_20, %c0_21], %35 {strides = array<i32>} : memref<16x16xbf16, #tpu.memory_space<vmem>>, vector<16x16xbf16>,
    return
  }
  func.func @transform_0(%arg0: i32) -> (i32, i32) {
    %c0_i32 = arith.constant 0 : i32
    %c0_i32_0 = arith.constant 0 : i32
    %c0_i32_1 = arith.constant 0 : i32
    return %c0_i32, %c0_i32_0 : i32, i32
  }
  func.func @transform_1(%arg0: i32) -> (i32, i32) {
    %c0_i32 = arith.constant 0 : i32
    %c0_i32_0 = arith.constant 0 : i32
    %c0_i32_1 = arith.constant 0 : i32
    return %c0_i32, %c0_i32_0 : i32, i32
  }
  func.func @transform_2(%arg0: i32) -> (i32, i32) {
    %c0_i32 = arith.constant 0 : i32
    %c0_i32_0 = arith.constant 0 : i32
    %c0_i32_1 = arith.constant 0 : i32
    return %c0_i32, %c0_i32_0 : i32, i32
  }
  func.func @transform_3(%arg0: i32) -> (i32, i32) {
    %c0_i32 = arith.constant 0 : i32
    %c0_i32_0 = arith.constant 0 : i32
    %c0_i32_1 = arith.constant 0 : i32
    return %c0_i32, %c0_i32_0 : i32, i32
  }
  func.func @transform_4(%arg0: i32) -> (i32, i32) {
    %c0_i32 = arith.constant 0 : i32
    %c0_i32_0 = arith.constant 0 : i32
    %c0_i32_1 = arith.constant 0 : i32
    return %c0_i32, %c0_i32_0 : i32, i32
  }
  func.func @transform_5(%arg0: i32) -> (i32, i32) {
    %c0_i32 = arith.constant 0 : i32
    %c0_i32_0 = arith.constant 0 : i32
    %c0_i32_1 = arith.constant 0 : i32
    return %c0_i32, %c0_i32_0 : i32, i32
  }
  func.func @transform_6(%arg0: i32) -> (i32, i32) {
    %c0_i32 = arith.constant 0 : i32
    %c0_i32_0 = arith.constant 0 : i32
    %c0_i32_1 = arith.constant 0 : i32
    return %c0_i32, %c0_i32_0 : i32, i32
  }
}

</mosaic_0001>

<bundles_post_ra>
// kernel: tpu_custom_call.1
= control target key start
LH: loop header
LB: loop body
LE: loop exit
PB: predicated region body
PF: predicated region fallthrough
CT: control target
= control target key end

     0   :  { %vm44_vm0 = vcmask 1043456   ;;  %v433_v1 = vmov 0.0   ;;  %vm434_vm1 = vmmov 0   ;;  %vm40_vm2 = vcmask 64512   ;;  %s512_s0 = inlined_call_operand.vmem [shape: bf16[16,8], index: 0, kind: input, shape index: {}]   ;;  %s513_s1 = inlined_call_operand.vmem [shape: bf16[8,16], index: 1, kind: input, shape index: {}]   ;;  %s514_s2 = inlined_call_operand.vmem [shape: f32[1,16], index: 2, kind: input, shape index: {}]   ;;  %s515_s3 = inlined_call_operand.vmem [shape: f32[1,16], index: 3, kind: input, shape index: {}]   ;;  %s516_s4 = inlined_call_operand.vmem [shape: f32[1,16], index: 4, kind: input, shape index: {}]   ;;  %s517_s5 = inlined_call_operand.vmem [shape: bf16[16,16], index: 5, kind: input, shape index: {}]   ;;  %s518_s6 = inlined_call_operand.hbm [shape: bf16[16,16], index: 6, kind: output, shape index: {}]  }
   0x1   :  { %v27_v0 = vld [vmem:[%s513_s1] sm:$0xf]  ;;  %366 = vmatprep.subr.bf16.mxu0 %v433_v1  ;;  %368 = vmatprep.mubr.msk.bf16.mxu0 %vm434_vm1, %v433_v1 }
   0x2   :  { %v46_v2 = vsel %vm44_vm0, %v27_v0, 0  ;;  %v405_v3 = vld [vmem:[%s512_s0] sm:$0xff]   ;;  %376 = vmatprep.mubr.msk.f32.mxu1 %vm434_vm1, %v433_v1 }
   0x3   :  { %367 = vmatpush3.bf16.msra.mxu0 %v46_v2 }
   0x4   :  { %386 = vmatprep.subr.bf16.mxu0 %v433_v1 }
   0x5   :  { %11 = vsyncpa [#allocation3], 0  ;;  %v435_v4 = vmov 0.0|0.0   ;;  %v345_v5 = vld [vmem:[%s514_s2] ss:$0 sm:$0xff]  ;;  %vm89_vm3 = vcmask 130048   ;;  %v248_v28 = vlaneseq }
   0x6   :  { %369 = vmatmul.mubr.msk.bf16.vlgmr.msra.gmra.mrb[0].mxu0 %vm40_vm2, %v405_v3  ;;  %392 = vmatprep.subr.bf16.mxu1 %v435_v4  ;;  %v436_v16 = vmov 1.0   ;;  %v406_v17 = vld [vmem:[%s517_s5] sm:$0xff]   ;;  %vm326_vm4 = vcmask 125952  }
   0x7   :  { %388 = vmatprep.mubr.msk.bf16.mxu0 %vm434_vm1, %v433_v1  ;;  %387 = vmatpush3.bf16.msra.mxu0 %v406_v17  ;;  %v249_v29 = vshrl.u32 %v248_v28, 7  ;;  %v240_v30 = vld [vmem:[%s515_s3] sm:$0x1]  ;;  %s437_s3 = smov [#allocation2]  }
   0x8   :  { %v244_v34 = vld [vmem:[%s516_s4] sm:$0x1]  ;;  %s334_s29 = sshll.u32 %s437_s3, 4  ;;  %s335_s29 = int_to_ptr.vmem [resolvable:$true] %s334_s29 }
   0x9   :  { %v250_v31 = vsub.s32 0, %v249_v29  ;;  %s409_s4 = scalar_lea.vmem %s335_s29, 128  ;;  %p414_p1 = scmp.lt.s32.totalorder %s335_s29, %s335_s29 }
   0xa   :  { %p410_p0 = scmp.ne.s32.totalorder %s335_s29, %s409_s4  ;;  %p415_p2 = scmp.lt.s32.totalorder %s409_s4, %s409_s4 }
   0xc   :  { %p416_p3 = por %p415_p2, %p414_p1 }
   0xe   :  { %p417_p4 = pnand %p416_p3, %p410_p0 }
  0xd9   :  { %v82_v6 = vpop.f32.mrb[0].mxu0 }
  0xda   :  { %v370_v7 = vpop.f32.mrb[1].mxu0  ;;  %v83_v9 = vadd.f32 %v345_v5, %v82_v6 }
  0xdb   :  { %v85_v8 = vpop.f32.mrb[2].mxu0 }
  0xdc   :  { %v86_v10 = vadd.f32 %v345_v5, %v85_v8  ;;  %v371_v11 = vpop.f32.mrb[3].mxu0  ;;  %v163_v14 = vmul.f32 %v83_v9, %v83_v9 }
  0xde   :  { %v164_v12 = vmul.f32 %v86_v10, %v86_v10  ;;  %v393_v13 = vpack.c.bf16 %v86_v10, %v83_v9 }
  0xe0   :  { %394 = vmatpush3.bf16.msra.mxu1 %v393_v13  ;;  %v396_v15 = vpack.c.bf16 %v164_v12, %v163_v14 }
  0xe1   :  { %395 = vmatprep.subr.bf16.mxu1 %v435_v4 }
  0xe3   :  { %377 = vmatmul.mubr.msk.f32.vlgmr.msra.gmra.mrb[0].mxu1 %vm89_vm3, %v436_v16 }
  0xe4   :  { %397 = vmatpush3.bf16.msra.mxu1 %v396_v15  ;;  %383 = vmatprep.mubr.msk.f32.mxu1 %vm434_vm1, %v433_v1 }
  0xe7   :  { %384 = vmatmul.mubr.msk.f32.vlgmr.msra.gmra.mrb[2].mxu1 %vm89_vm3, %v436_v16 }
 0x1b6   :  { %v159_v18 = vpop.f32.mrb[0].mxu1 }
 0x1b7   :  { %v235_v19 = vmul.f32 0.0625, %v159_v18  ;;  %v378_v20 = vpop.f32.mrb[1].mxu1 }
 0x1b9   :  { %v237_v22 = vmul.f32 %v235_v19, %v235_v19 }
 0x1ba   :  { %v231_v21 = vpop.f32.mrb[2].mxu1 }
 0x1bb   :  { %v236_v23 = vmul.f32 0.0625, %v231_v21  ;;  %v385_v24 = vpop.f32.mrb[3].mxu1 }
 0x1bd   :  { %v238_v25 = vsub.f32 %v236_v23, %v237_v22 }
 0x1bf   :  { %v239_v26 = vmax.f32 %v238_v25, 0.0 }
 0x1c1   :  { %v241_v27 = vadd.f32 1e-05, %v239_v26 }
 0x1c3   :  { %407 = vrsqrt.f32 %v241_v27 }
 0x1cd   :  { %v408_v32 = vpop.eup %407 }
 0x1ce   :  { %v243_v33 = vmul.f32 %v408_v32, %v240_v30 }
 0x1d0   :  { %v245_v35 = vmul.f32 %v243_v33, %v235_v19  ;;  %v251_v36 = vrot.slane %v243_v33, %v250_v31 }
 0x1d2   :  { %v246_v37 = vsub.f32 %v244_v34, %v245_v35  ;;  %v253_v38 = vmul.f32 %v251_v36, %v83_v9  ;;  %v254_v39 = vmul.f32 %v251_v36, %v86_v10 }
 0x1d4   :  { %v259_v40 = vrot.slane %v246_v37, %v250_v31 }
 0x1d6   :  { %v261_v41 = vadd.f32 %v259_v40, %v253_v38  ;;  %v262_v42 = vadd.f32 %v259_v40, %v254_v39 }
 0x1d8   :  { %v263_v43 = vmax.f32 %v261_v41, 0.0  ;;  %v264_v44 = vmax.f32 %v262_v42, 0.0 }
 0x1da   :  { %v265_v45 = vpack.c.bf16 %v264_v44, %v263_v43 }
 0x1dc   :  { %389 = vmatmul.mubr.msk.bf16.vlgmr.msra.gmra.mrb[4].mxu0 %vm89_vm3, %v265_v45 }
 0x2af   :  { %v311_v46 = vpop.f32.mrb[4].mxu0 }
 0x2b0   :  { %v354_v47 = vpack.c.bf16 %v311_v46, %v311_v46  ;;  %v390_v48 = vpop.f32.mrb[5].mxu0 }
 0x2b1   :  { %v314_v49 = vpop.f32.mrb[6].mxu0 }
 0x2b2   :  { %327 = vst.msk [vmem:[#allocation2] sm:$0xf] %vm326_vm4, %v354_v47  ;;  %v355_v50 = vpack.c.bf16 %v314_v49, %v314_v49  ;;  %v391_v51 = vpop.f32.mrb[7].mxu0 }
 0x2b4   :  { %328 = vst.msk [vmem:[#allocation2 + $0x4] sm:$0xf] %vm326_vm4, %v355_v50 }
 0x2b5   :  { %420 = shalt.err (!%p417_p4)
}
 0x2b6   :  { %s421_s8 = scalar_lea.hbm %s518_s6, 128 }
 0x2b7   :  { %p422_p5 = scmp.ne.s32.totalorder %s518_s6, %s421_s8  ;;  %p425_p6 = scmp.lt.u32.totalorder %s421_s8, %s518_s6 }
 0x2b9   :  { %p427_p7 = pnand %p425_p6, %p422_p5 }
 0x2bb   :  { %430 = shalt.err (!%p427_p7)
}
 0x2bc   :  { %s438_s13 = smov 64   ;;  %s439_s14 = smov 4  }
 0x2bd   :  { %340 = dma.vmem_to_hbm [thread:$0]  %s335_s29, 128, %s518_s6, [#allocation3], %s438_s13, %s438_s13, %s439_s14  }
 0x2be   :  { %431 = dma.done.wait [#allocation3], 128  }
 0x2bf   :  { %432 = vsyncadd [#allocation3], 4294967168 }
 0x2c0   :  { %344 = vsyncpa [#allocation3], 1 }

</bundles_post_ra>
